<compile_context>
chip_gen: v6e
topology: v6e:2x2x1
jax: 0.10.0
libtpu: 0.0.40
codegen_flags: <defaults>
</compile_context>

<pallas_src>
import functools

import jax
import jax.numpy as jnp
from jax.experimental import pallas as pl
from jax.experimental.pallas import tpu as pltpu

EPS = 1e-8
_LANES = 128
_MAX_TILE_ROWS = 2048   # 2048 * 128 * 4B = 1 MiB per f32 input buffer


def _pow_static(x, beta):
    """x**beta for x > 0 with a *static* beta, avoiding log+exp when possible."""
    b = float(beta)
    if b == 1.0:
        return x
    if b == 2.0:
        return x * x
    if b == 0.5:
        return jnp.sqrt(x)
    if b == 1.5:
        return x * jnp.sqrt(x)                 # 1 EUP op + 1 VPU mul
    if b == int(b) and 1.0 <= b <= 8.0:        # small integer powers: VPU only
        r = x
        for _ in range(int(b) - 1):
            r = r * x
        return r
    if 2.0 * b == int(2.0 * b) and 0.0 < b <= 8.0:   # half-integer: sqrt * x^n
        r = jnp.sqrt(x)
        for _ in range(int(b)):
            r = r * x
        return r
    return jnp.power(x, b)                     # general fallback (log+exp)


def _gmadl_partial_kernel(pred_ref, true_ref, part_ref, *, beta, n_valid):
    """One grid step: (TR, 128) block -> lane-dense (1, 8, 128) partial sum."""
    i = pl.program_id(0)
    p = pred_ref[...].astype(jnp.float32)
    t = true_ref[...].astype(jnp.float32)
    loss = _pow_static(jnp.abs(p - t) + EPS, beta)          # (TR, C) f32

    tr, c = loss.shape
    # Exact mask for padded tail elements (flat index >= n_valid).
    row = jax.lax.broadcasted_iota(jnp.int32, (tr, c), 0)
    lane = jax.lax.broadcasted_iota(jnp.int32, (tr, c), 1)
    flat = (i * tr + row) * c + lane
    loss = jnp.where(flat < n_valid, loss, 0.0)

    # Fold rows into a single (8, C) vreg-shaped partial with pure VPU adds
    # (tile-aligned reshape, no XLU cross-lane reduce in the hot loop).
    part_ref[...] = loss.reshape(tr // 8, 8, c).sum(axis=0).reshape(1, 8, c)


def _gmadl_elem_kernel(pred_ref, true_ref, out_ref, *, beta):
    """Elementwise loss (reduction='none')."""
    p = pred_ref[...].astype(jnp.float32)
    t = true_ref[...].astype(jnp.float32)
    out_ref[...] = _pow_static(jnp.abs(p - t) + EPS, beta).astype(out_ref.dtype)


def gmadl_loss(pred, true, beta=1.5, reduction="mean"):
    """GMADL loss: reduce(|pred - true| + eps) ** beta, reduce in {mean,sum,none}."""
    assert pred.shape == true.shape, (pred.shape, true.shape)
    orig_shape = pred.shape

    n = 1
    for d in orig_shape:
        n *= int(d)
    c = _LANES
    rows = -(-n // c)                                   # ceil(n / 128)
    tile_rows = max(8, min(_MAX_TILE_ROWS, -(-rows // 8) * 8))
    grid = -(-rows // tile_rows)
    rows_pad = grid * tile_rows
    pad = rows_pad * c - n

    def to2d(x):
        flat = x.reshape(-1)
        if pad:
            flat = jnp.pad(flat, (0, pad))              # pads with 0s
        return flat.reshape(rows_pad, c)

    p2 = to2d(pred)
    t2 = to2d(true)

    in_specs = [
        pl.BlockSpec((tile_rows, c), lambda i: (i, 0)),
        pl.BlockSpec((tile_rows, c), lambda i: (i, 0)),
    ]
    cparams = pltpu.CompilerParams(dimension_semantics=("parallel",))

    if reduction in ("mean", "sum"):
        kernel = functools.partial(_gmadl_partial_kernel, beta=beta, n_valid=n)
        partials = pl.pallas_call(
            kernel,
            out_shape=jax.ShapeDtypeStruct((grid, 8, c), jnp.float32),
            grid=(grid,),
            in_specs=in_specs,
            out_specs=pl.BlockSpec((1, 8, c), lambda i: (i, 0, 0)),
            compiler_params=cparams,
        )(p2, t2)
        total = jnp.sum(partials)                        # tiny final reduce in JAX
        if reduction == "mean":
            return total / jnp.float32(n)
        return total

    elif reduction == "none":
        kernel = functools.partial(_gmadl_elem_kernel, beta=beta)
        out2d = pl.pallas_call(
            kernel,
            out_shape=jax.ShapeDtypeStruct((rows_pad, c), pred.dtype),
            grid=(grid,),
            in_specs=in_specs,
            out_specs=pl.BlockSpec((tile_rows, c), lambda i: (i, 0)),
            compiler_params=cparams,
        )(p2, t2)
        return out2d.reshape(-1)[:n].reshape(orig_shape)

    else:
        raise ValueError(f"unknown reduction: {reduction!r}")


def _reference(pred, true, beta=1.5, reduction="mean"):
    loss = jnp.power(
        jnp.abs(pred.astype(jnp.float32) - true.astype(jnp.float32)) + EPS, beta
    )
    if reduction == "mean":
        return jnp.mean(loss)
    if reduction == "sum":
        return jnp.sum(loss)
    return loss


if __name__ == "__main__":
    key = jax.random.PRNGKey(0)
    k1, k2 = jax.random.split(key)
    B, S, F = 2, 8, 32
    pred = jax.random.normal(k1, (B, S, F), dtype=jnp.float32)
    true = jax.random.normal(k2, (B, S, F), dtype=jnp.float32)

    # mean reduction (default module config: beta=1.5, reduction='mean')
    out_mean = jax.block_until_ready(gmadl_loss(pred, true, beta=1.5, reduction="mean"))
    ref_mean = _reference(pred, true, 1.5, "mean")
    assert jnp.allclose(out_mean, ref_mean, rtol=1e-5, atol=1e-6), (out_mean, ref_mean)

    # sum reduction
    out_sum = jax.block_until_ready(gmadl_loss(pred, true, beta=1.5, reduction="sum"))
    ref_sum = _reference(pred, true, 1.5, "sum")
    assert jnp.allclose(out_sum, ref_sum, rtol=1e-5, atol=1e-5), (out_sum, ref_sum)

    # 'none' reduction (full per-element tensor)
    out_none = jax.block_until_ready(gmadl_loss(pred, true, beta=1.5, reduction="none"))
    ref_none = _reference(pred, true, 1.5, "none")
    assert out_none.shape == (B, S, F)
    assert jnp.allclose(out_none, ref_none, rtol=1e-5, atol=1e-6)

    # bf16 inputs: cast to f32 happens inside the kernel (no f32 HBM round-trip)
    pred_bf = pred.astype(jnp.bfloat16)
    true_bf = true.astype(jnp.bfloat16)
    out_bf = jax.block_until_ready(gmadl_loss(pred_bf, true_bf))
    ref_bf = _reference(pred_bf, true_bf, 1.5, "mean")
    assert jnp.allclose(out_bf, ref_bf, rtol=1e-2, atol=1e-3), (out_bf, ref_bf)

    print("KERNEL_OK")
</pallas_src>

<mosaic_0001>
module attributes {stable_mosaic.version = 11 : i64} {
  func.func @_gmadl_partial_kernel(%arg0: i32, %arg1: memref<8x128xf32, #tpu.memory_space<vmem>>, %arg2: memref<8x128xf32, #tpu.memory_space<vmem>>, %arg3: memref<1x8x128xf32, #tpu.memory_space<vmem>>) attributes {dimension_semantics = [#tpu.dimension_semantics<parallel>], iteration_bounds = array<i64: 1>, scalar_prefetch = 0 : i64, scratch_operands = 0 : i64, tpu.core_type = #tpu.core_type<tc>, window_params = [{transform_indices = @transform_0, window_bounds = array<i64: 8, 128>}, {transform_indices = @transform_1, window_bounds = array<i64: 8, 128>}, {transform_indices = @transform_2, window_bounds = array<i64: 1, 8, 128>}]} {
    %c0 = arith.constant 0 : index
    %c0_0 = arith.constant 0 : index
    %0 = vector.load %arg1[%c0, %c0_0] : memref<8x128xf32, #tpu.memory_space<vmem>>, vector<8x128xf32>
    %c0_1 = arith.constant 0 : index
    %c0_2 = arith.constant 0 : index
    %1 = vector.load %arg2[%c0_1, %c0_2] : memref<8x128xf32, #tpu.memory_space<vmem>>, vector<8x128xf32>
    %2 = arith.subf %0, %1 : vector<8x128xf32>
    %3 = math.absf %2 : vector<8x128xf32>
    %cst = arith.constant 9.99999993E-9 : f32
    %4 = vector.broadcast %cst : f32 to vector<8x128xf32>
    %5 = arith.addf %3, %4 : vector<8x128xf32>
    %6 = math.sqrt %5 : vector<8x128xf32>
    %7 = arith.mulf %5, %6 : vector<8x128xf32>
    %8 = tpu.iota {dimensions = array<i32: 0>} : vector<8x128xi32>
    %9 = tpu.iota {dimensions = array<i32: 1>} : vector<8x128xi32>
    %c8_i32 = arith.constant 8 : i32
    %10 = arith.muli %arg0, %c8_i32 : i32
    %11 = vector.broadcast %10 : i32 to vector<8x128xi32>
    %12 = arith.addi %11, %8 : vector<8x128xi32>
    %c128_i32 = arith.constant 128 : i32
    %13 = vector.broadcast %c128_i32 : i32 to vector<8x128xi32>
    %14 = arith.muli %12, %13 : vector<8x128xi32>
    %15 = arith.addi %14, %9 : vector<8x128xi32>
    %c512_i32 = arith.constant 512 : i32
    %16 = vector.broadcast %c512_i32 : i32 to vector<8x128xi32>
    %17 = arith.cmpi slt, %15, %16 : vector<8x128xi32>
    %cst_3 = arith.constant 0.000000e+00 : f32
    %18 = vector.broadcast %cst_3 : f32 to vector<8x128xf32>
    %19 = arith.select %17, %7, %18 : vector<8x128xi1>, vector<8x128xf32>
    %20 = vector.shape_cast %19 : vector<8x128xf32> to vector<1x8x128xf32>
    %cst_4 = arith.constant dense<0.000000e+00> : vector<8x128xf32>
    %21 = vector.multi_reduction <add>, %20, %cst_4 [0] : vector<1x8x128xf32> to vector<8x128xf32>
    %22 = vector.shape_cast %21 : vector<8x128xf32> to vector<1x8x128xf32>
    %c0_5 = arith.constant 0 : index
    %c0_6 = arith.constant 0 : index
    %c0_7 = arith.constant 0 : index
    %23 = vector.load %arg3[%c0_5, %c0_6, %c0_7] : memref<1x8x128xf32, #tpu.memory_space<vmem>>, vector<1x8x128xf32>
    tpu.vector_store %arg3[%c0_5, %c0_6, %c0_7], %22 {strides = array<i32>} : memref<1x8x128xf32, #tpu.memory_space<vmem>>, vector<1x8x128xf32>,
    return
  }
  func.func @transform_0(%arg0: i32) -> (i32, i32) {
    %c0_i32 = arith.constant 0 : i32
    %c0_i32_0 = arith.constant 0 : i32
    return %arg0, %c0_i32 : i32, i32
  }
  func.func @transform_1(%arg0: i32) -> (i32, i32) {
    %c0_i32 = arith.constant 0 : i32
    %c0_i32_0 = arith.constant 0 : i32
    return %arg0, %c0_i32 : i32, i32
  }
  func.func @transform_2(%arg0: i32) -> (i32, i32, i32) {
    %c0_i32 = arith.constant 0 : i32
    %c0_i32_0 = arith.constant 0 : i32
    %c0_i32_1 = arith.constant 0 : i32
    return %arg0, %c0_i32, %c0_i32_0 : i32, i32, i32
  }
}

</mosaic_0001>

<bundles_post_ra>
// kernel: tpu_custom_call.1
= control target key start
LH: loop header
LB: loop body
LE: loop exit
PB: predicated region body
PF: predicated region fallthrough
CT: control target
= control target key end

     0   :  { %7 = vsyncpa [#allocation3], 0  ;;  %s176_s0 = inlined_call_operand.hbm [shape: f32[8,128], index: 0, kind: input, shape index: {}]   ;;  %s177_s1 = inlined_call_operand.hbm [shape: f32[8,128], index: 1, kind: input, shape index: {}]   ;;  %s178_s2 = inlined_call_operand.hbm [shape: f32[1,8,128], index: 2, kind: output, shape index: {}]  }
   0x1   :  { %8 = vsyncpa [#allocation6], 0 }
   0x2   :  { %9 = vsyncpa [#allocation4], 0  ;;  %s149_s9 = smov [#allocation2]   ;;  %s150_s11 = smov [#allocation5]  }
   0x3   :  { %s16_s10 = sshll.u32 %s149_s9, 4  ;;  %s26_s12 = sshll.u32 %s150_s11, 4  ;;  %s17_s10 = int_to_ptr.vmem [resolvable:$true] %s16_s10  ;;  %s27_s12 = int_to_ptr.vmem [resolvable:$true] %s26_s12 }
   0x4   :  { %s91_s13 = scalar_lea.vmem %s17_s10, 128  ;;  %p96_p1 = scmp.lt.s32.totalorder %s17_s10, %s17_s10 }
   0x5   :  { %p92_p0 = scmp.ne.s32.totalorder %s17_s10, %s91_s13  ;;  %p97_p2 = scmp.lt.s32.totalorder %s91_s13, %s91_s13 }
   0x7   :  { %p98_p3 = por %p97_p2, %p96_p1 }
   0x9   :  { %p99_p4 = pnand %p98_p3, %p92_p0 }
   0xb   :  { %102 = shalt.err (!%p99_p4)
}
   0xc   :  { %19 = dma.hbm_to_vmem [thread:$0]  %s176_s0, 128, %s17_s10, [#allocation3]  }
   0xd   :  { %s111_s16 = scalar_lea.vmem %s27_s12, 128  ;;  %p116_p6 = scmp.lt.s32.totalorder %s27_s12, %s27_s12 }
   0xe   :  { %p112_p5 = scmp.ne.s32.totalorder %s27_s12, %s111_s16  ;;  %p117_p7 = scmp.lt.s32.totalorder %s111_s16, %s111_s16 }
  0x10   :  { %p118_p8 = por %p117_p7, %p116_p6 }
  0x12   :  { %p119_p9 = pnand %p118_p8, %p112_p5 }
  0x14   :  { %122 = shalt.err (!%p119_p9)
}
  0x15   :  { %29 = dma.hbm_to_vmem [thread:$0]  %s177_s1, 128, %s27_s12, [#allocation6]  }
  0x16   :  { %143 = dma.done.wait [#allocation3], 128  }
  0x17   :  { %144 = vsyncadd [#allocation3], 4294967168 }
  0x18   :  { %145 = dma.done.wait [#allocation6], 128  }
  0x19   :  { %146 = vsyncadd [#allocation6], 4294967168  ;;  %v36_v0 = vld [vmem:[#allocation2] sm:$0xff]  ;;  %v37_v1 = vld [vmem:[#allocation5] sm:$0xff]  ;;  %v49_v5 = vlaneseq  ;;  %s151_s0 = smov [#allocation7]  }
  0x1a   :  { %v38_v2 = vsub.f32 %v36_v0, %v37_v1  ;;  %s68_s1 = sshll.u32 %s151_s0, 4  ;;  %s69_s1 = int_to_ptr.vmem [resolvable:$true] %s68_s1 }
  0x1b   :  { %v50_v6 = vshrl.u32 %v49_v5, 7  ;;  %v52_v7 = vand.u32 127, %v49_v5  ;;  %s123_s19 = scalar_lea.vmem %s69_s1, 128  ;;  %p128_p11 = scmp.lt.s32.totalorder %s69_s1, %s69_s1 }
  0x1c   :  { %v39_v3 = vand.u32 2147483647, %v38_v2  ;;  %p124_p10 = scmp.ne.s32.totalorder %s69_s1, %s123_s19  ;;  %p129_p12 = scmp.lt.s32.totalorder %s123_s19, %s123_s19 }
  0x1d   :  { %v56_v8 = vmul.u32 128, %v50_v6 }
  0x1e   :  { %v40_v4 = vadd.f32 1e-08, %v39_v3  ;;  %p130_p13 = por %p129_p12, %p128_p11 }
  0x1f   :  { %v57_v11 = vadd.s32 %v56_v8, %v52_v7 }
  0x20   :  { %81 = vrsqrt.f32 %v40_v4  ;;  %vm43_vm0 = vcmp.eq.f32.partialorder %v40_v4, inf  ;;  %v46_v10 = vand.u32 2147483648, %v40_v4  ;;  %vm45_vm1 = vcmp.eq.f32.partialorder %v40_v4, 0.0  ;;  %p131_p0 = pnand %p130_p13, %p124_p10 }
  0x21   :  { %vm58_vm2 = vcmp.lt.s32.totalorder %v57_v11, 512 }
  0x2d   :  { %v82_v9 = vpop.eup %81 }
  0x2e   :  { %v42_v12 = vmul.f32 %v82_v9, %v40_v4 }
  0x30   :  { %v44_v13 = vsel %vm43_vm0, %v40_v4, %v42_v12 }
  0x31   :  { %v47_v14 = vsel %vm45_vm1, %v46_v10, %v44_v13 }
  0x32   :  { %v48_v15 = vmul.f32 %v47_v14, %v40_v4 }
  0x34   :  { %v59_v16 = vsel %vm58_vm2, %v48_v15, 0.0 }
  0x35   :  { %61 = vst [vmem:[#allocation7] sm:$0xff] %v59_v16 }
  0x36   :  { %134 = shalt.err (!%p131_p0)
}
  0x37   :  { %71 = dma.vmem_to_hbm [thread:$0]  %s69_s1, 128, %s178_s2, [#allocation4]  }
  0x38   :  { %147 = dma.done.wait [#allocation4], 128  }
  0x39   :  { %148 = vsyncadd [#allocation4], 4294967168 }
  0x3a   :  { %75 = vsyncpa [#allocation3], 1 }
  0x3b   :  { %76 = vsyncpa [#allocation6], 1 }
  0x3c   :  { %77 = vsyncpa [#allocation4], 1 }

</bundles_post_ra>
